<compile_context>
chip_gen: v7x
topology: tpu7x:2x2x1
jax: 0.10.0
libtpu: 0.0.40
codegen_flags: <defaults>
</compile_context>

<pallas_src>
import jax
import jax.numpy as jnp
from jax.experimental import pallas as pl
from jax.experimental.pallas import tpu as pltpu


def _dma_copy_kernel(x_ref, o_ref, sem):
    # Single HBM→HBM DMA of the whole (already squeezed-shape) array.
    # No VMEM staging, no vreg traffic — pure roofline memcpy.
    copy = pltpu.make_async_copy(x_ref, o_ref, sem)
    copy.start()
    copy.wait()


def _materialized_copy(x):
    """HBM→HBM copy of `x` via a single Pallas DMA (used only when an
    explicitly materialized result is required)."""
    return pl.pallas_call(
        _dma_copy_kernel,
        out_shape=jax.ShapeDtypeStruct(x.shape, x.dtype),
        in_specs=[pl.BlockSpec(memory_space=pl.ANY)],
        out_specs=pl.BlockSpec(memory_space=pl.ANY),
        scratch_shapes=[pltpu.SemaphoreType.DMA(())],
    )(x)


def squeeze_dim1(x, *, materialize=False):
    """Replicates torch.squeeze(x, dim=1).

    Default path is a free metadata reshape (what XLA/torch do for a view).
    Set materialize=True if a physically separate output buffer is required;
    that path issues one HBM→HBM DMA through a Pallas kernel.
    """
    if x.ndim < 2:
        # torch.squeeze(x, dim=1) raises IndexError (dim out of range) for
        # 0-D / 1-D inputs — mirror that instead of silently passing through.
        raise IndexError(
            f"Dimension out of range (got dim=1 for a {x.ndim}-D tensor)"
        )

    if x.shape[1] != 1:
        # torch no-op: dim 1 has size != 1 -> return the input unchanged
        # (view semantics, zero HBM traffic).
        return x

    out_shape = x.shape[:1] + x.shape[2:]
    y = x.reshape(out_shape)  # pure metadata op: zero data movement

    if not materialize:
        return y

    # Explicitly materialized copy: one full-array HBM→HBM DMA.
    return _materialized_copy(y)


if __name__ == "__main__":
    key = jax.random.PRNGKey(0)

    # Primary case for Squeeze(dim=1): (B, 1, H, W) -> (B, H, W).
    x = jax.random.normal(key, (2, 1, 16, 16), dtype=jnp.float32)
    ref = jnp.squeeze(x, axis=1)

    # Fast (metadata-only) path.
    out = squeeze_dim1(x)
    jax.block_until_ready(out)
    assert out.shape == (2, 16, 16), out.shape
    assert out.dtype == x.dtype
    assert jnp.array_equal(out, ref)

    # Materialized-copy path: exercises the Pallas HBM→HBM DMA kernel once.
    out_copy = squeeze_dim1(x, materialize=True)
    jax.block_until_ready(out_copy)
    assert out_copy.shape == (2, 16, 16), out_copy.shape
    assert out_copy.dtype == x.dtype
    assert jnp.array_equal(out_copy, ref)

    # No-op branch: torch.squeeze(x, dim=1) with a size-4 dim returns x as-is.
    x2 = jax.random.normal(jax.random.PRNGKey(1), (2, 4, 16, 16), jnp.float32)
    out2 = squeeze_dim1(x2)
    jax.block_until_ready(out2)
    assert out2.shape == x2.shape
    assert jnp.array_equal(out2, x2)

    print("KERNEL_OK")
</pallas_src>

<mosaic_0001>
module attributes {stable_mosaic.version = 11 : i64} {
  func.func @_dma_copy_kernel(%arg0: memref<2x16x16xf32, #tpu.memory_space<any>>, %arg1: memref<2x16x16xf32, #tpu.memory_space<any>>, %arg2: memref<!tpu.dma_semaphore, #tpu.memory_space<semaphore_mem>>) attributes {dimension_semantics = [], scalar_prefetch = 0 : i64, scratch_operands = 1 : i64, tpu.core_type = #tpu.core_type<tc>} {
    tpu.enqueue_dma source(%arg0 : memref<2x16x16xf32, #tpu.memory_space<any>>) target(%arg1 : memref<2x16x16xf32, #tpu.memory_space<any>>) target_semaphore(%arg2 : memref<!tpu.dma_semaphore, #tpu.memory_space<semaphore_mem>>)
    tpu.wait_dma2 semaphore(%arg2 : memref<!tpu.dma_semaphore, #tpu.memory_space<semaphore_mem>>) src(%arg0 : memref<2x16x16xf32, #tpu.memory_space<any>>) dst(%arg1 : memref<2x16x16xf32, #tpu.memory_space<any>>)
    return
  }
}

</mosaic_0001>

<bundles_post_ra>
// kernel: tpu_custom_call.1
= control target key start
LH: loop header
LB: loop body
LE: loop exit
PB: predicated region body
PF: predicated region fallthrough
CT: control target
= control target key end

     0   :  { %s35_s6 = smov [#allocation2]   ;;  %s36_s7 = smov [#allocation3]   ;;  %s54_s0 = inlined_call_operand.hbm [shape: f32[2,16,16], index: 0, kind: input, shape index: {}]   ;;  %s55_s1 = inlined_call_operand.hbm [shape: f32[2,16,16], index: 1, kind: output, shape index: {}]  }
   0x1   :  { %s37_s8 = smov 0  }
   0x2   :  { %18 = dma.general %s54_s0, 512, %s55_s1, %s35_s6, %s36_s7, [#allocation4], %s37_s8, 0  }
   0x3   :  { %33 = dma.done.wait [#allocation2], 512 }
   0x4   :  { %34 = vsyncadd [#allocation2], 4294966784 }
   0x5   :  { %23 = vsyncmov [#allocation2] }
   0x8   :  { %s24_s13 = vpop.sfrf %23 }
   0x9   :  { %p29_p0 = scmp.ne.s32.totalorder %s24_s13, 0 }
   0xb   :  { %28 = shalt.err (%p29_p0)  }

</bundles_post_ra>
